<compile_context>
chip_gen: v7x
topology: tpu7x:2x2x1
jax: 0.10.0
libtpu: 0.0.40
codegen_flags: <defaults>
</compile_context>

<pallas_src>
import math

import jax
import jax.numpy as jnp
from jax import lax
from jax.experimental import pallas as pl
from jax.experimental.pallas import tpu as pltpu

NEG_HALF_LOG_2PI = -0.5 * math.log(2.0 * math.pi)


def _round_up(v, m):
    return (v + m - 1) // m * m


def my_head_kernel(x_ref, mu_ref, a_ref, inv_ref, b_ref, o_ref):
    """One [TN, D] tile of x against all (lane-padded) K components."""
    x = x_ref[...]                                        # [TN, D] f32
    # Cross term on the MXU; contract the lane (D) dims of both operands
    # directly — no explicit .T / XLU transpose of mu.
    xmuT = lax.dot_general(
        x, mu_ref[...], (((1,), (1,)), ((), ())),
        preferred_element_type=jnp.float32)               # [TN, K_pad]
    # Per-row ||x||^2 (lane reduce -> column vector).
    x2 = jnp.sum(x * x, axis=1, keepdims=True)            # [TN, 1]
    # Fused epilogue with hoisted per-K rows: 3 VPU ops per element.
    o_ref[...] = (xmuT * a_ref[...] - x2 * inv_ref[...] - b_ref[...]).astype(
        o_ref.dtype)


def my_head(x, mu, std, *, tn=512):
    n, d = x.shape
    k, d2 = mu.shape
    assert d == d2 and std.shape == (k, d)

    x32 = x.astype(jnp.float32)
    mu32 = mu.astype(jnp.float32)
    std32 = std.astype(jnp.float32)

    # ---- Hoisted K-only statistics (tiny [K] vectors, computed once). ----
    mu2 = jnp.sum(mu32 * mu32, axis=1)                    # sum_d mu^2
    s2 = jnp.sum(std32 * std32, axis=1)                   # sum_d std^2
    ss = jnp.sum(std32, axis=1)                           # sum_d std
    inv = 1.0 / (2.0 * s2 + 1e-8)                         # 1 / denom
    a = 2.0 * inv
    b = mu2 * inv + jnp.log(ss) - NEG_HALF_LOG_2PI

    # ---- Pad K to lane width (128) so stores / MXU columns are dense. ----
    k_pad = _round_up(max(k, 1), 128)
    mu_p = jnp.zeros((k_pad, d), jnp.float32).at[:k].set(mu32)
    a_p = jnp.zeros((1, k_pad), jnp.float32).at[0, :k].set(a)
    inv_p = jnp.zeros((1, k_pad), jnp.float32).at[0, :k].set(inv)
    b_p = jnp.zeros((1, k_pad), jnp.float32).at[0, :k].set(b)

    # ---- Tile over N (pipelined grid axis, parallel across TensorCores). ----
    tn_eff = min(tn, _round_up(n, 8))
    n_pad = _round_up(n, tn_eff)
    x_p = x32 if n_pad == n else jnp.zeros((n_pad, d), jnp.float32).at[:n].set(x32)
    grid = (n_pad // tn_eff,)

    # VMEM budget: double-buffered x/out tiles + resident mu & stat rows.
    est_bytes = 4 * (2 * tn_eff * d          # x (double-buffered)
                     + k_pad * d             # mu (resident)
                     + 3 * k_pad             # a / inv / b rows
                     + 2 * tn_eff * k_pad)   # out (double-buffered)
    vmem_limit = int(min(max(4 * est_bytes, 32 << 20), 48 << 20))

    out = pl.pallas_call(
        my_head_kernel,
        out_shape=jax.ShapeDtypeStruct((n_pad, k_pad), jnp.float32),
        grid_spec=pltpu.PrefetchScalarGridSpec(
            num_scalar_prefetch=0,
            grid=grid,
            in_specs=[
                pl.BlockSpec((tn_eff, d), lambda i: (i, 0)),   # x tile
                pl.BlockSpec((k_pad, d), lambda i: (0, 0)),    # mu (resident)
                pl.BlockSpec((1, k_pad), lambda i: (0, 0)),    # a row
                pl.BlockSpec((1, k_pad), lambda i: (0, 0)),    # inv row
                pl.BlockSpec((1, k_pad), lambda i: (0, 0)),    # b row
            ],
            out_specs=pl.BlockSpec((tn_eff, k_pad), lambda i: (i, 0)),
        ),
        compiler_params=pltpu.CompilerParams(
            dimension_semantics=("parallel",),
            vmem_limit_bytes=vmem_limit,
        ),
    )(x_p, mu_p, a_p, inv_p, b_p)

    return out[:n, :k]


def my_head_ref(x, mu, std):
    # Pure-JAX reference mirroring the PyTorch broadcasting exactly.
    xe = x[:, None, :]     # [N, 1, D]
    me = mu[None, :, :]    # [1, K, D]
    se = std[None, :, :]   # [1, K, D]
    return (
        -jnp.sum((xe - me) ** 2, axis=2)
        / (2.0 * jnp.sum(se ** 2, axis=2) + 1e-8)
        - jnp.log(jnp.sum(se, axis=2))
        + NEG_HALF_LOG_2PI
    )


if __name__ == "__main__":
    key = jax.random.PRNGKey(0)
    kx, kmu, kstd = jax.random.split(key, 3)

    # Small deterministic inputs: N=8 samples, K=4 components, D=32 features.
    N, K, D = 8, 4, 32
    x = jax.random.normal(kx, (N, D), dtype=jnp.float32)
    mu = jax.random.normal(kmu, (K, D), dtype=jnp.float32)
    # std must be positive (log of its sum), as a GMM head implies.
    std = jax.random.uniform(kstd, (K, D), dtype=jnp.float32,
                             minval=0.5, maxval=1.5)

    out = jax.block_until_ready(my_head(x, mu, std))
    ref = my_head_ref(x, mu, std)
    assert out.shape == (N, K)
    assert jnp.allclose(out, ref, atol=1e-4, rtol=1e-4), (
        f"max abs err {jnp.max(jnp.abs(out - ref))}")

    # Exercise the multi-tile (gridded, padded-N) path as well.
    N2 = 640
    x2 = jax.random.normal(kx, (N2, D), dtype=jnp.float32)
    out2 = jax.block_until_ready(my_head(x2, mu, std, tn=256))
    ref2 = my_head_ref(x2, mu, std)
    assert out2.shape == (N2, K)
    assert jnp.allclose(out2, ref2, atol=1e-4, rtol=1e-4), (
        f"max abs err {jnp.max(jnp.abs(out2 - ref2))}")

    print("KERNEL_OK")
</pallas_src>

<mosaic_0001>
module attributes {stable_mosaic.version = 11 : i64} {
  func.func @my_head_kernel(%arg0: i32, %arg1: memref<8x32xf32, #tpu.memory_space<vmem>>, %arg2: memref<128x32xf32, #tpu.memory_space<vmem>>, %arg3: memref<1x128xf32, #tpu.memory_space<vmem>>, %arg4: memref<1x128xf32, #tpu.memory_space<vmem>>, %arg5: memref<1x128xf32, #tpu.memory_space<vmem>>, %arg6: memref<8x128xf32, #tpu.memory_space<vmem>>) attributes {dimension_semantics = [#tpu.dimension_semantics<parallel>], iteration_bounds = array<i64: 1>, scalar_prefetch = 0 : i64, scratch_operands = 0 : i64, tpu.core_type = #tpu.core_type<tc>, window_params = [{transform_indices = @transform_0, window_bounds = array<i64: 8, 32>}, {pipeline_mode = #tpu.pipeline_mode<synchronous>, transform_indices = @transform_1, window_bounds = array<i64: 128, 32>}, {pipeline_mode = #tpu.pipeline_mode<synchronous>, transform_indices = @transform_2, window_bounds = array<i64: 1, 128>}, {pipeline_mode = #tpu.pipeline_mode<synchronous>, transform_indices = @transform_3, window_bounds = array<i64: 1, 128>}, {pipeline_mode = #tpu.pipeline_mode<synchronous>, transform_indices = @transform_4, window_bounds = array<i64: 1, 128>}, {transform_indices = @transform_5, window_bounds = array<i64: 8, 128>}]} {
    %c0 = arith.constant 0 : index
    %c0_0 = arith.constant 0 : index
    %0 = vector.load %arg1[%c0, %c0_0] : memref<8x32xf32, #tpu.memory_space<vmem>>, vector<8x32xf32>
    %c0_1 = arith.constant 0 : index
    %c0_2 = arith.constant 0 : index
    %1 = vector.load %arg2[%c0_1, %c0_2] : memref<128x32xf32, #tpu.memory_space<vmem>>, vector<128x32xf32>
    %cst = arith.constant dense<0.000000e+00> : vector<8x128xf32>
    %2 = tpu.matmul %0, %1, %cst {dimension_numbers = #tpu.dot_dimension_numbers<[1], [1], [0], [0], [0, 0, 1, 0], [], []>} : vector<8x32xf32>, vector<128x32xf32>, vector<8x128xf32> -> vector<8x128xf32>
    %3 = arith.mulf %0, %0 : vector<8x32xf32>
    %cst_3 = arith.constant dense<0.000000e+00> : vector<8xf32>
    %4 = vector.multi_reduction <add>, %3, %cst_3 [1] : vector<8x32xf32> to vector<8xf32>
    %5 = vector.shape_cast %4 : vector<8xf32> to vector<8x1xf32>
    %c0_4 = arith.constant 0 : index
    %c0_5 = arith.constant 0 : index
    %6 = vector.load %arg3[%c0_4, %c0_5] : memref<1x128xf32, #tpu.memory_space<vmem>>, vector<1x128xf32>
    %7 = vector.broadcast %6 : vector<1x128xf32> to vector<8x128xf32>
    %8 = arith.mulf %2, %7 : vector<8x128xf32>
    %c0_6 = arith.constant 0 : index
    %c0_7 = arith.constant 0 : index
    %9 = vector.load %arg4[%c0_6, %c0_7] : memref<1x128xf32, #tpu.memory_space<vmem>>, vector<1x128xf32>
    %10 = vector.broadcast %5 : vector<8x1xf32> to vector<8x128xf32>
    %11 = vector.broadcast %9 : vector<1x128xf32> to vector<8x128xf32>
    %12 = arith.mulf %10, %11 : vector<8x128xf32>
    %13 = arith.subf %8, %12 : vector<8x128xf32>
    %c0_8 = arith.constant 0 : index
    %c0_9 = arith.constant 0 : index
    %14 = vector.load %arg5[%c0_8, %c0_9] : memref<1x128xf32, #tpu.memory_space<vmem>>, vector<1x128xf32>
    %15 = vector.broadcast %14 : vector<1x128xf32> to vector<8x128xf32>
    %16 = arith.subf %13, %15 : vector<8x128xf32>
    %c0_10 = arith.constant 0 : index
    %c0_11 = arith.constant 0 : index
    %17 = vector.load %arg6[%c0_10, %c0_11] : memref<8x128xf32, #tpu.memory_space<vmem>>, vector<8x128xf32>
    tpu.vector_store %arg6[%c0_10, %c0_11], %16 {strides = array<i32>} : memref<8x128xf32, #tpu.memory_space<vmem>>, vector<8x128xf32>,
    return
  }
  func.func @transform_0(%arg0: i32) -> (i32, i32) {
    %c0_i32 = arith.constant 0 : i32
    %c0_i32_0 = arith.constant 0 : i32
    return %arg0, %c0_i32 : i32, i32
  }
  func.func @transform_1(%arg0: i32) -> (i32, i32) {
    %c0_i32 = arith.constant 0 : i32
    %c0_i32_0 = arith.constant 0 : i32
    %c0_i32_1 = arith.constant 0 : i32
    return %c0_i32, %c0_i32_0 : i32, i32
  }
  func.func @transform_2(%arg0: i32) -> (i32, i32) {
    %c0_i32 = arith.constant 0 : i32
    %c0_i32_0 = arith.constant 0 : i32
    %c0_i32_1 = arith.constant 0 : i32
    return %c0_i32, %c0_i32_0 : i32, i32
  }
  func.func @transform_3(%arg0: i32) -> (i32, i32) {
    %c0_i32 = arith.constant 0 : i32
    %c0_i32_0 = arith.constant 0 : i32
    %c0_i32_1 = arith.constant 0 : i32
    return %c0_i32, %c0_i32_0 : i32, i32
  }
  func.func @transform_4(%arg0: i32) -> (i32, i32) {
    %c0_i32 = arith.constant 0 : i32
    %c0_i32_0 = arith.constant 0 : i32
    %c0_i32_1 = arith.constant 0 : i32
    return %c0_i32, %c0_i32_0 : i32, i32
  }
  func.func @transform_5(%arg0: i32) -> (i32, i32) {
    %c0_i32 = arith.constant 0 : i32
    %c0_i32_0 = arith.constant 0 : i32
    return %arg0, %c0_i32 : i32, i32
  }
}

</mosaic_0001>

<bundles_post_ra>
// kernel: tpu_custom_call.1
= control target key start
LH: loop header
LB: loop body
LE: loop exit
PB: predicated region body
PF: predicated region fallthrough
CT: control target
= control target key end

     0   :  { %vm38_vm0 = vcmask 261120   ;;  %v336_v2 = vmov 0.0|0.0   ;;  %vm337_vm2 = vmmov 0   ;;  %v338_v5 = vmov 0.0   ;;  %s466_s0 = inlined_call_operand.vmem [shape: f32[8,32], index: 0, kind: input, shape index: {}]   ;;  %s467_s1 = inlined_call_operand.vmem [shape: f32[128,32], index: 1, kind: input, shape index: {}]   ;;  %s468_s2 = inlined_call_operand.vmem [shape: f32[1,128], index: 2, kind: input, shape index: {}]   ;;  %s469_s3 = inlined_call_operand.vmem [shape: f32[1,128], index: 3, kind: input, shape index: {}]   ;;  %s470_s4 = inlined_call_operand.vmem [shape: f32[1,128], index: 4, kind: input, shape index: {}]   ;;  %s471_s5 = inlined_call_operand.hbm [shape: f32[8,128], index: 5, kind: output, shape index: {}]  }
   0x1   :  { %v22_v0 = vld [vmem:[%s467_s1] sm:$0xff]  ;;  %v23_v1 = vld [vmem:[%s467_s1 + $0x8] sm:$0xff]  ;;  %276 = vmatprep.subr.bf16.mxu0 %v336_v2  ;;  %vm378_vm1 = vmpackc.low %vm38_vm0, %vm38_vm0  ;;  %273 = vmatprep.mubr.msk.f32.mxu0 %vm337_vm2, %v338_v5 }
   0x2   :  { %v277_v3 = vpack.c.bf16 %v23_v1, %v22_v0  ;;  %v24_v6 = vld [vmem:[%s467_s1 + $0x10] sm:$0xff]  ;;  %v25_v7 = vld [vmem:[%s467_s1 + $0x18] sm:$0xff]  ;;  %v21_v8 = vld [vmem:[%s466_s0] sm:$0xff] }
   0x3   :  { %v160_v9 = vmul.f32 %v21_v8, %v21_v8 }
   0x4   :  { %279 = vmatpush3.bf16.xpose.msk.msra.mxu0 %vm378_vm1, %v277_v3 }
   0x5   :  { %280 = vmatprep.subr.bf16.mxu0 %v336_v2 }
   0x6   :  { %10 = vsyncpa [#allocation3], 0  ;;  %v281_v10 = vpack.c.bf16 %v25_v7, %v24_v6  ;;  %v161_v11 = vsel %vm38_vm0, %v160_v9, 0.0  ;;  %v26_v12 = vld [vmem:[%s467_s1 + $0x20] sm:$0xff]  ;;  %v27_v13 = vld [vmem:[%s467_s1 + $0x28] sm:$0xff]  ;;  %s339_s6 = smov [#allocation2]  }
   0x7   :  { %162 = vadd.xlane.f32.xlu0 %v161_v11  ;;  %v285_v14 = vpack.c.bf16 %v27_v13, %v26_v12  ;;  %v28_v15 = vld [vmem:[%s467_s1 + $0x30] sm:$0xff]  ;;  %v29_v16 = vld [vmem:[%s467_s1 + $0x38] sm:$0xff]  ;;  %v30_v18 = vld [vmem:[%s467_s1 + $0x40] sm:$0xff]  ;;  %s196_s0 = sshll.u32 %s339_s6, 4  ;;  %s197_s0 = int_to_ptr.vmem [resolvable:$true] %s196_s0 }
   0x8   :  { %v289_v17 = vpack.c.bf16 %v29_v16, %v28_v15  ;;  %v31_v19 = vld [vmem:[%s467_s1 + $0x48] sm:$0xff]  ;;  %v32_v21 = vld [vmem:[%s467_s1 + $0x50] sm:$0xff]  ;;  %v33_v22 = vld [vmem:[%s467_s1 + $0x58] sm:$0xff]  ;;  %s312_s7 = scalar_lea.vmem %s197_s0, 128  ;;  %p317_p1 = scmp.lt.s32.totalorder %s197_s0, %s197_s0 }
   0x9   :  { %v293_v20 = vpack.c.bf16 %v31_v19, %v30_v18  ;;  %v297_v23 = vpack.c.bf16 %v33_v22, %v32_v21  ;;  %v34_v24 = vld [vmem:[%s467_s1 + $0x60] sm:$0xff]  ;;  %v35_v25 = vld [vmem:[%s467_s1 + $0x68] sm:$0xff]  ;;  %v36_v27 = vld [vmem:[%s467_s1 + $0x70] sm:$0xff]  ;;  %p313_p0 = scmp.ne.s32.totalorder %s197_s0, %s312_s7  ;;  %p318_p2 = scmp.lt.s32.totalorder %s312_s7, %s312_s7 }
   0xa   :  { %v301_v26 = vpack.c.bf16 %v35_v25, %v34_v24  ;;  %v37_v28 = vld [vmem:[%s467_s1 + $0x78] sm:$0xff]  ;;  %v222_v31 = vld [vmem:[%s469_s3] ss:$0 sm:$0xff] }
   0xb   :  { %v305_v29 = vpack.c.bf16 %v37_v28, %v36_v27  ;;  %v221_v32 = vld [vmem:[%s468_s2] ss:$0 sm:$0xff]  ;;  %p319_p3 = por %p318_p2, %p317_p1 }
   0xc   :  { %283 = vmatpush3.bf16.xpose.msk.msra.mxu0 %vm378_vm1, %v281_v10  ;;  %v223_v37 = vld [vmem:[%s470_s4] ss:$0 sm:$0xff] }
   0xd   :  { %284 = vmatprep.subr.bf16.mxu0 %v336_v2  ;;  %p320_p4 = pnand %p319_p3, %p313_p0 }
  0x14   :  { %287 = vmatpush3.bf16.xpose.msk.msra.mxu0 %vm378_vm1, %v285_v14 }
  0x15   :  { %288 = vmatprep.subr.bf16.mxu0 %v336_v2 }
  0x1c   :  { %291 = vmatpush3.bf16.xpose.msk.msra.mxu0 %vm378_vm1, %v289_v17 }
  0x1d   :  { %292 = vmatprep.subr.bf16.mxu0 %v336_v2 }
  0x24   :  { %295 = vmatpush3.bf16.xpose.msk.msra.mxu0 %vm378_vm1, %v293_v20 }
  0x25   :  { %296 = vmatprep.subr.bf16.mxu0 %v336_v2 }
  0x2c   :  { %299 = vmatpush3.bf16.xpose.msk.msra.mxu0 %vm378_vm1, %v297_v23 }
  0x2d   :  { %300 = vmatprep.subr.bf16.mxu0 %v336_v2 }
  0x34   :  { %303 = vmatpush3.bf16.xpose.msk.msra.mxu0 %vm378_vm1, %v301_v26 }
  0x35   :  { %304 = vmatprep.subr.bf16.mxu0 %v336_v2 }
  0x3c   :  { %307 = vmatpush3.bf16.xpose.msk.msra.mxu0 %vm378_vm1, %v305_v29 }
  0x43   :  { %274 = vmatmul.mubr.msk.f32.vlgmr.msra.gmra.mrb[0].mxu0 %vm38_vm0, %v21_v8 }
  0x94   :  { %v163_v30 = vpop.xlane.xlu0 %162 }
  0x95   :  { %v179_v33 = vmul.f32 %v222_v31, %v163_v30 }
 0x116   :  { %v156_v34 = vpop.f32.mrb[0].mxu0 }
 0x117   :  { %v171_v35 = vmul.f32 %v221_v32, %v156_v34  ;;  %v275_v36 = vpop.f32.mrb[1].mxu0 }
 0x119   :  { %v180_v38 = vsub.f32 %v171_v35, %v179_v33 }
 0x11b   :  { %v188_v39 = vsub.f32 %v180_v38, %v223_v37 }
 0x11d   :  { %189 = vst [vmem:[#allocation2] sm:$0xff] %v188_v39 }
 0x11e   :  { %323 = shalt.err (!%p320_p4)
}
 0x11f   :  { %s324_s8 = scalar_lea.hbm %s471_s5, 128 }
 0x120   :  { %p325_p5 = scmp.ne.s32.totalorder %s471_s5, %s324_s8  ;;  %p328_p6 = scmp.lt.u32.totalorder %s324_s8, %s471_s5 }
 0x122   :  { %p330_p7 = pnand %p328_p6, %p325_p5 }
 0x124   :  { %333 = shalt.err (!%p330_p7)
}
 0x125   :  { %199 = dma.vmem_to_hbm [thread:$0]  %s197_s0, 128, %s471_s5, [#allocation3]  }
 0x126   :  { %334 = dma.done.wait [#allocation3], 128  }
 0x127   :  { %335 = vsyncadd [#allocation3], 4294967168 }
 0x128   :  { %203 = vsyncpa [#allocation3], 1 }

</bundles_post_ra>
